<compile_context>
chip_gen: v7x
topology: tpu7x:2x2x1
jax: 0.10.0
libtpu: 0.0.40
codegen_flags: <defaults>
</compile_context>

<pallas_src>
import functools

import jax
import jax.numpy as jnp
from jax.experimental import pallas as pl
from jax.experimental.pallas import tpu as pltpu


_LANE = 128   # lane width (last-dim alignment)
_SUB = 128    # row alignment for N (multiple of the 8-sublane tile / MXU edge)


def _pad_to(x, mult, axis):
    """Zero-pad `axis` of x up to a multiple of `mult`."""
    size = x.shape[axis]
    pad = (-size) % mult
    if pad == 0:
        return x
    widths = [(0, 0)] * x.ndim
    widths[axis] = (0, pad)
    return jnp.pad(x, widths)


def _fused_gcn_kernel(*refs, num_layers, num_masks, agg_first, num_chunks, chunk):
    """All GraphConv layers in one invocation; H resident in VMEM.

    Ref layout (all 2-D, feature axes padded to multiples of 128, rows to 128):
      refs[0]                    : A_hat (HBM, bf16)  (Np, Np)   -- manual DMA
      refs[1]                    : H_0   (VMEM, bf16) (Np, F0p)
      refs[2 + 2*i] / [3 + 2*i]  : W_i (bf16, Fip x Fop) / b_i (f32, 1 x Fop)
      refs[2 + 2L + j]           : keep-mask for layer j+1 (bf16, {0, 1/(1-p)})
      refs[2 + 2L + num_masks]   : out (VMEM, f32) (Np, FLp)
      last two                   : adj VMEM scratch (Np, Np) bf16, DMA sems
    """
    adj_hbm = refs[0]
    h0_ref = refs[1]
    w_refs = [refs[2 + 2 * i] for i in range(num_layers)]
    b_refs = [refs[3 + 2 * i] for i in range(num_layers)]
    mask_refs = list(refs[2 + 2 * num_layers: 2 + 2 * num_layers + num_masks])
    out_ref = refs[2 + 2 * num_layers + num_masks]
    adj_vmem = refs[2 + 2 * num_layers + num_masks + 1]
    sems = refs[2 + 2 * num_layers + num_masks + 2]

    # 1) Kick off the N^2 adjacency stream HBM->VMEM as dst-row chunks so the
    #    DMA overlaps layer-0 compute (the dominant exposed cost before).
    copies = []
    for c in range(num_chunks):
        rows = pl.ds(c * chunk, chunk)
        cp = pltpu.make_async_copy(adj_hbm.at[rows], adj_vmem.at[rows], sems.at[c])
        cp.start()
        copies.append(cp)

    # 2) Layer-0 transform (independent of the adjacency) runs under the DMAs.
    hw0 = jnp.dot(h0_ref[...], w_refs[0][...], preferred_element_type=jnp.float32)
    hw0_bf = hw0.astype(jnp.bfloat16)
    b0 = b_refs[0][...]

    # 3) Layer-0 aggregation per dst-row chunk as each chunk lands.
    rows_out = []
    for c in range(num_chunks):
        copies[c].wait()
        a_c = adj_vmem[pl.ds(c * chunk, chunk), :]                      # bf16
        o_c = jnp.dot(a_c, hw0_bf, preferred_element_type=jnp.float32) + b0
        if num_layers == 1:
            out_ref[pl.ds(c * chunk, chunk), :] = o_c.astype(out_ref.dtype)
        else:
            rows_out.append(jnp.maximum(o_c, 0.0).astype(jnp.bfloat16))

    if num_layers == 1:
        return

    h = rows_out[0] if num_chunks == 1 else jnp.concatenate(rows_out, axis=0)

    # 4) Layers >= 1 reuse the fully VMEM-resident adjacency.
    for i in range(1, num_layers):
        if num_masks:
            # Inverted dropout: mask already holds {0, 1/(1-p)} in bf16.
            h = h * mask_refs[i - 1][...]
        w = w_refs[i][...]
        if agg_first[i]:
            # f_out > f_in: aggregate first so the N^2 matmul runs at width f_in.
            ah = jnp.dot(adj_vmem[...], h, preferred_element_type=jnp.float32)
            out = jnp.dot(ah.astype(jnp.bfloat16), w,
                          preferred_element_type=jnp.float32)
        else:
            # f_out <= f_in: transform first so the N^2 matmul runs at width f_out.
            hw = jnp.dot(h, w, preferred_element_type=jnp.float32)
            out = jnp.dot(adj_vmem[...], hw.astype(jnp.bfloat16),
                          preferred_element_type=jnp.float32)
        out = out + b_refs[i][...]
        if i != num_layers - 1:
            h = jnp.maximum(out, 0.0).astype(jnp.bfloat16)   # ReLU, carry bf16
        else:
            out_ref[...] = out.astype(out_ref.dtype)          # lane/row-dense store


def normalize_adj(adj):
    """A_hat = D_in^{-1/2} A D_out^{-1/2}  (DGL GraphConv norm='both')."""
    deg_in = jnp.maximum(adj.sum(axis=1), 1.0)    # in-degree of dst
    deg_out = jnp.maximum(adj.sum(axis=0), 1.0)   # out-degree of src
    return (1.0 / jnp.sqrt(deg_in))[:, None] * adj * (1.0 / jnp.sqrt(deg_out))[None, :]


def make_dropout_masks(key, n, params, prob_dropout):
    """Keep-masks (0/1, float32) for layers 1..L-1 (layer 0 has no dropout)."""
    p = float(prob_dropout)
    if p <= 0.0 or len(params) <= 1:
        return None
    masks = []
    for i in range(1, len(params)):
        key, sub = jax.random.split(key)
        f_in = params[i][0].shape[0]
        masks.append(jax.random.bernoulli(sub, 1.0 - p, (n, f_in)).astype(jnp.float32))
    return masks


def _vmem_capacity_bytes():
    try:
        return int(pltpu.get_tpu_info().vmem_capacity_bytes)
    except Exception:
        return 64 << 20   # conservative (v7x per-TensorCore)


def gcn_forward_pallas(adj_hat, features, params, masks, prob_dropout):
    """Fused GCN forward: all GraphConv layers in one pallas_call.

    params: list of (W, b) with W (f_in, f_out), b (1, f_out) or (f_out,).
    masks:  list of 0/1 keep-masks (N, f_in_i) for layers 1..L-1, or None (eval).
    """
    n = adj_hat.shape[0]
    num_layers = len(params)
    out_feats = params[-1][0].shape[1]
    p = float(prob_dropout)
    use_dropout = (masks is not None) and p > 0.0 and num_layers > 1

    n_pad = n + ((-n) % _SUB)

    # bf16 adjacency (padded on both axes); stays in HBM, streamed in-kernel.
    adj_bf = _pad_to(_pad_to(adj_hat.astype(jnp.bfloat16), _SUB, 0), _SUB, 1)
    feats = _pad_to(_pad_to(features.astype(jnp.bfloat16), _SUB, 0), _LANE, 1)

    wb_inputs = []
    agg_first = []
    padded_dims = []
    for (w, b) in params:
        f_in, f_out = w.shape
        f_in_p = f_in + ((-f_in) % _LANE)
        f_out_p = f_out + ((-f_out) % _LANE)
        padded_dims.append((f_in_p, f_out_p))
        agg_first.append(bool(f_out_p > f_in_p))
        wb_inputs.append(_pad_to(_pad_to(w.astype(jnp.bfloat16), _LANE, 0), _LANE, 1))
        wb_inputs.append(_pad_to(jnp.reshape(b, (1, -1)).astype(jnp.float32), _LANE, 1))

    mask_inputs = []
    if use_dropout:
        inv_keep = 1.0 / (1.0 - p)
        for m in masks:
            # Fold the inverted-dropout scale into the 0/1 mask; bf16 is exact
            # for 0 and near-exact for 1/(1-p) (well within bf16 matmul noise).
            m_s = (m.astype(jnp.float32) * inv_keep).astype(jnp.bfloat16)
            mask_inputs.append(_pad_to(_pad_to(m_s, _SUB, 0), _LANE, 1))
    num_masks = len(mask_inputs)

    inputs = [adj_bf, feats] + wb_inputs + mask_inputs
    out_pad = padded_dims[-1][1]

    # dst-row chunking of the adjacency stream (256 rows when aligned).
    chunk = 256 if n_pad % 256 == 0 else _SUB
    num_chunks = n_pad // chunk

    # --- VMEM budget (single-buffered inputs + adj scratch + intermediates) ---
    vmem_inputs = sum(int(x.size) * x.dtype.itemsize for x in inputs[1:])  # adj in HBM
    adj_scratch = n_pad * n_pad * 2                                        # bf16 scratch
    out_bytes = n_pad * out_pad * 4
    fmax = max(max(fi, fo) for (fi, fo) in padded_dims)
    intermediates = 4 * n_pad * fmax * 4        # h / hw / ah / out live f32-equivalents
    est = vmem_inputs + adj_scratch + out_bytes + intermediates + (2 << 20)

    cap = _vmem_capacity_bytes()
    usable = int(cap * 0.85)                    # ~54 MiB on v7x, ~108 MiB on v5e/v6e
    assert est < usable, (
        "fused GCN kernel is for VMEM-resident graphs; use a tiled per-layer "
        f"kernel for this size (need ~{est >> 20} MiB, usable {usable >> 20} MiB)")
    vmem_limit = int(min(max(est + (4 << 20), 32 << 20), usable))

    # --- Cost estimate for the XLA scheduler ---
    flops = 0
    for (fi, fo) in padded_dims:
        flops += 2 * n_pad * n_pad * min(fi, fo)   # aggregation matmul
        flops += 2 * n_pad * fi * fo               # feature transform
    bytes_acc = sum(int(x.size) * x.dtype.itemsize for x in inputs) + out_bytes
    cost = pl.CostEstimate(flops=flops, transcendentals=0, bytes_accessed=bytes_acc)

    kernel = functools.partial(
        _fused_gcn_kernel,
        num_layers=num_layers,
        num_masks=num_masks,
        agg_first=tuple(agg_first),
        num_chunks=num_chunks,
        chunk=chunk,
    )

    vmem_spec = pl.BlockSpec(memory_space=pltpu.MemorySpace.VMEM)
    in_specs = [pl.BlockSpec(memory_space=pl.ANY)] + [vmem_spec] * (len(inputs) - 1)

    # TODO(synk): on v7x, split the dst-row chunks across both TensorCores
    # (core_map + per-layer cross-core exchange) and optionally store the
    # adjacency stream in fp8.
    out_p = pl.pallas_call(
        kernel,
        out_shape=jax.ShapeDtypeStruct((n_pad, out_pad), jnp.float32),
        in_specs=in_specs,
        out_specs=vmem_spec,
        scratch_shapes=[
            pltpu.VMEM((n_pad, n_pad), jnp.bfloat16),
            pltpu.SemaphoreType.DMA((num_chunks,)),
        ],
        compiler_params=pltpu.CompilerParams(vmem_limit_bytes=vmem_limit),
        cost_estimate=cost,
    )(*inputs)

    return out_p[:n, :out_feats]


def gcn_forward_reference(adj_hat, features, params, masks, prob_dropout):
    """Pure-JAX reference with identical semantics (and identical masks)."""
    p = float(prob_dropout)
    h = features.astype(jnp.float32)
    num_layers = len(params)
    use_dropout = (masks is not None) and p > 0.0 and num_layers > 1
    scale = 1.0 / (1.0 - p) if use_dropout else 1.0
    for i, (w, b) in enumerate(params):
        if i != 0 and use_dropout:
            h = h * masks[i - 1] * scale
        h = adj_hat @ (h @ w) + jnp.reshape(b, (1, -1))
        if i != num_layers - 1:
            h = jnp.maximum(h, 0.0)
    return h


if __name__ == "__main__":
    N, IN_FEATS, HID_FEATS, OUT_FEATS = 64, 16, 32, 8
    NUMS_LAYERS = 2          # -> 3 GraphConv layers total (in->hid, hid->hid, hid->out)
    PROB_DROPOUT = 0.5

    key = jax.random.PRNGKey(0)
    k_adj, k_feat, k_w, k_drop = jax.random.split(key, 4)

    # Deterministic synthetic graph: sparse symmetric adjacency + self loops.
    a = (jax.random.uniform(k_adj, (N, N)) < 0.1).astype(jnp.float32)
    adj = jnp.maximum(jnp.maximum(a, a.T), jnp.eye(N, dtype=jnp.float32))
    adj_hat = normalize_adj(adj)

    features = jax.random.normal(k_feat, (N, IN_FEATS), dtype=jnp.float32)

    # Deterministic parameter init (Glorot uniform like DGL GraphConv, zero bias).
    dims = [IN_FEATS] + [HID_FEATS] * NUMS_LAYERS + [OUT_FEATS]
    params = []
    for f_in, f_out in zip(dims[:-1], dims[1:]):
        k_w, sub = jax.random.split(k_w)
        limit = (6.0 / (f_in + f_out)) ** 0.5
        w = jax.random.uniform(sub, (f_in, f_out), minval=-limit, maxval=limit,
                               dtype=jnp.float32)
        b = jnp.zeros((1, f_out), dtype=jnp.float32)
        params.append((w, b))

    masks = make_dropout_masks(k_drop, N, params, PROB_DROPOUT)

    out = gcn_forward_pallas(adj_hat, features, params, masks, PROB_DROPOUT)
    out = jax.block_until_ready(out)

    ref = gcn_forward_reference(adj_hat, features, params, masks, PROB_DROPOUT)
    assert out.shape == (N, OUT_FEATS)
    # bf16 MXU inputs / bf16 inter-layer activations with f32 accumulation
    # -> generous tolerance vs the f32 reference.
    assert jnp.allclose(out, ref, atol=1e-1, rtol=1e-1), float(jnp.max(jnp.abs(out - ref)))
    print("KERNEL_OK")
</pallas_src>

<mosaic_0001>
module attributes {stable_mosaic.version = 11 : i64} {
  func.func @_fused_gcn_kernel(%arg0: memref<128x128xbf16, #tpu.memory_space<any>>, %arg1: memref<128x128xbf16, #tpu.memory_space<vmem>>, %arg2: memref<128x128xbf16, #tpu.memory_space<vmem>>, %arg3: memref<1x128xf32, #tpu.memory_space<vmem>>, %arg4: memref<128x128xbf16, #tpu.memory_space<vmem>>, %arg5: memref<1x128xf32, #tpu.memory_space<vmem>>, %arg6: memref<128x128xbf16, #tpu.memory_space<vmem>>, %arg7: memref<1x128xf32, #tpu.memory_space<vmem>>, %arg8: memref<128x128xbf16, #tpu.memory_space<vmem>>, %arg9: memref<128x128xbf16, #tpu.memory_space<vmem>>, %arg10: memref<128x128xf32, #tpu.memory_space<vmem>>, %arg11: memref<128x128xbf16, #tpu.memory_space<vmem>>, %arg12: memref<1x!tpu.dma_semaphore, #tpu.memory_space<semaphore_mem>>) attributes {dimension_semantics = [], scalar_prefetch = 0 : i64, scratch_operands = 2 : i64, tpu.core_type = #tpu.core_type<tc>} {
    %c0_i32 = arith.constant 0 : i32
    %c0_i32_0 = arith.constant 0 : i32
    %c0_i32_1 = arith.constant 0 : i32
    %0 = tpu.memref_slice %arg0[%c0_i32_0, %c0_i32_1] : memref<128x128xbf16, #tpu.memory_space<any>> -> memref<128x128xbf16, #tpu.memory_space<any>>
    %c0_i32_2 = arith.constant 0 : i32
    %c0_i32_3 = arith.constant 0 : i32
    %1 = tpu.memref_slice %arg11[%c0_i32_2, %c0_i32_3] : memref<128x128xbf16, #tpu.memory_space<vmem>> -> memref<128x128xbf16, #tpu.memory_space<vmem>>
    %2 = tpu.memref_slice %arg12[%c0_i32] : memref<1x!tpu.dma_semaphore, #tpu.memory_space<semaphore_mem>> -> memref<1x!tpu.dma_semaphore, #tpu.memory_space<semaphore_mem>>
    %3 = tpu.memref_squeeze %2 : memref<1x!tpu.dma_semaphore, #tpu.memory_space<semaphore_mem>> -> memref<!tpu.dma_semaphore, #tpu.memory_space<semaphore_mem>>
    tpu.enqueue_dma source(%0 : memref<128x128xbf16, #tpu.memory_space<any>>) target(%1 : memref<128x128xbf16, #tpu.memory_space<vmem>>) target_semaphore(%3 : memref<!tpu.dma_semaphore, #tpu.memory_space<semaphore_mem>>)
    %c0 = arith.constant 0 : index
    %c0_4 = arith.constant 0 : index
    %4 = vector.load %arg1[%c0, %c0_4] : memref<128x128xbf16, #tpu.memory_space<vmem>>, vector<128x128xbf16>
    %c0_5 = arith.constant 0 : index
    %c0_6 = arith.constant 0 : index
    %5 = vector.load %arg2[%c0_5, %c0_6] : memref<128x128xbf16, #tpu.memory_space<vmem>>, vector<128x128xbf16>
    %cst = arith.constant dense<0.000000e+00> : vector<128x128xf32>
    %6 = tpu.matmul %4, %5, %cst {dimension_numbers = #tpu.dot_dimension_numbers<[1], [0], [0], [1], [0, 0, 1, 1], [], []>} : vector<128x128xbf16>, vector<128x128xbf16>, vector<128x128xf32> -> vector<128x128xf32>
    %7 = arith.truncf %6 : vector<128x128xf32> to vector<128x128xbf16>
    %c0_7 = arith.constant 0 : index
    %c0_8 = arith.constant 0 : index
    %8 = vector.load %arg3[%c0_7, %c0_8] : memref<1x128xf32, #tpu.memory_space<vmem>>, vector<1x128xf32>
    %c0_i32_9 = arith.constant 0 : i32
    %c0_i32_10 = arith.constant 0 : i32
    %c0_i32_11 = arith.constant 0 : i32
    %9 = tpu.memref_slice %arg0[%c0_i32_10, %c0_i32_11] : memref<128x128xbf16, #tpu.memory_space<any>> -> memref<128x128xbf16, #tpu.memory_space<any>>
    %c0_i32_12 = arith.constant 0 : i32
    %c0_i32_13 = arith.constant 0 : i32
    %10 = tpu.memref_slice %arg11[%c0_i32_12, %c0_i32_13] : memref<128x128xbf16, #tpu.memory_space<vmem>> -> memref<128x128xbf16, #tpu.memory_space<vmem>>
    %11 = tpu.memref_slice %arg12[%c0_i32_9] : memref<1x!tpu.dma_semaphore, #tpu.memory_space<semaphore_mem>> -> memref<1x!tpu.dma_semaphore, #tpu.memory_space<semaphore_mem>>
    %12 = tpu.memref_squeeze %11 : memref<1x!tpu.dma_semaphore, #tpu.memory_space<semaphore_mem>> -> memref<!tpu.dma_semaphore, #tpu.memory_space<semaphore_mem>>
    tpu.wait_dma2 semaphore(%12 : memref<!tpu.dma_semaphore, #tpu.memory_space<semaphore_mem>>) src(%9 : memref<128x128xbf16, #tpu.memory_space<any>>) dst(%10 : memref<128x128xbf16, #tpu.memory_space<vmem>>)
    %c0_14 = arith.constant 0 : index
    %c0_15 = arith.constant 0 : index
    %13 = vector.load %arg11[%c0_14, %c0_15] : memref<128x128xbf16, #tpu.memory_space<vmem>>, vector<128x128xbf16>
    %cst_16 = arith.constant dense<0.000000e+00> : vector<128x128xf32>
    %14 = tpu.matmul %13, %7, %cst_16 {dimension_numbers = #tpu.dot_dimension_numbers<[1], [0], [0], [1], [0, 0, 1, 1], [], []>} : vector<128x128xbf16>, vector<128x128xbf16>, vector<128x128xf32> -> vector<128x128xf32>
    %15 = vector.broadcast %8 : vector<1x128xf32> to vector<128x128xf32>
    %16 = arith.addf %14, %15 : vector<128x128xf32>
    %cst_17 = arith.constant 0.000000e+00 : f32
    %17 = vector.broadcast %cst_17 : f32 to vector<128x128xf32>
    %18 = arith.maximumf %16, %17 : vector<128x128xf32>
    %19 = arith.truncf %18 : vector<128x128xf32> to vector<128x128xbf16>
    %c0_18 = arith.constant 0 : index
    %c0_19 = arith.constant 0 : index
    %20 = vector.load %arg8[%c0_18, %c0_19] : memref<128x128xbf16, #tpu.memory_space<vmem>>, vector<128x128xbf16>
    %21 = arith.mulf %19, %20 : vector<128x128xbf16>
    %c0_20 = arith.constant 0 : index
    %c0_21 = arith.constant 0 : index
    %22 = vector.load %arg4[%c0_20, %c0_21] : memref<128x128xbf16, #tpu.memory_space<vmem>>, vector<128x128xbf16>
    %cst_22 = arith.constant dense<0.000000e+00> : vector<128x128xf32>
    %23 = tpu.matmul %21, %22, %cst_22 {dimension_numbers = #tpu.dot_dimension_numbers<[1], [0], [0], [1], [0, 0, 1, 1], [], []>} : vector<128x128xbf16>, vector<128x128xbf16>, vector<128x128xf32> -> vector<128x128xf32>
    %c0_23 = arith.constant 0 : index
    %c0_24 = arith.constant 0 : index
    %24 = vector.load %arg11[%c0_23, %c0_24] : memref<128x128xbf16, #tpu.memory_space<vmem>>, vector<128x128xbf16>
    %25 = arith.truncf %23 : vector<128x128xf32> to vector<128x128xbf16>
    %cst_25 = arith.constant dense<0.000000e+00> : vector<128x128xf32>
    %26 = tpu.matmul %24, %25, %cst_25 {dimension_numbers = #tpu.dot_dimension_numbers<[1], [0], [0], [1], [0, 0, 1, 1], [], []>} : vector<128x128xbf16>, vector<128x128xbf16>, vector<128x128xf32> -> vector<128x128xf32>
    %c0_26 = arith.constant 0 : index
    %c0_27 = arith.constant 0 : index
    %27 = vector.load %arg5[%c0_26, %c0_27] : memref<1x128xf32, #tpu.memory_space<vmem>>, vector<1x128xf32>
    %28 = vector.broadcast %27 : vector<1x128xf32> to vector<128x128xf32>
    %29 = arith.addf %26, %28 : vector<128x128xf32>
    %cst_28 = arith.constant 0.000000e+00 : f32
    %30 = vector.broadcast %cst_28 : f32 to vector<128x128xf32>
    %31 = arith.maximumf %29, %30 : vector<128x128xf32>
    %32 = arith.truncf %31 : vector<128x128xf32> to vector<128x128xbf16>
    %c0_29 = arith.constant 0 : index
    %c0_30 = arith.constant 0 : index
    %33 = vector.load %arg9[%c0_29, %c0_30] : memref<128x128xbf16, #tpu.memory_space<vmem>>, vector<128x128xbf16>
    %34 = arith.mulf %32, %33 : vector<128x128xbf16>
    %c0_31 = arith.constant 0 : index
    %c0_32 = arith.constant 0 : index
    %35 = vector.load %arg6[%c0_31, %c0_32] : memref<128x128xbf16, #tpu.memory_space<vmem>>, vector<128x128xbf16>
    %cst_33 = arith.constant dense<0.000000e+00> : vector<128x128xf32>
    %36 = tpu.matmul %34, %35, %cst_33 {dimension_numbers = #tpu.dot_dimension_numbers<[1], [0], [0], [1], [0, 0, 1, 1], [], []>} : vector<128x128xbf16>, vector<128x128xbf16>, vector<128x128xf32> -> vector<128x128xf32>
    %c0_34 = arith.constant 0 : index
    %c0_35 = arith.constant 0 : index
    %37 = vector.load %arg11[%c0_34, %c0_35] : memref<128x128xbf16, #tpu.memory_space<vmem>>, vector<128x128xbf16>
    %38 = arith.truncf %36 : vector<128x128xf32> to vector<128x128xbf16>
    %cst_36 = arith.constant dense<0.000000e+00> : vector<128x128xf32>
    %39 = tpu.matmul %37, %38, %cst_36 {dimension_numbers = #tpu.dot_dimension_numbers<[1], [0], [0], [1], [0, 0, 1, 1], [], []>} : vector<128x128xbf16>, vector<128x128xbf16>, vector<128x128xf32> -> vector<128x128xf32>
    %c0_37 = arith.constant 0 : index
    %c0_38 = arith.constant 0 : index
    %40 = vector.load %arg7[%c0_37, %c0_38] : memref<1x128xf32, #tpu.memory_space<vmem>>, vector<1x128xf32>
    %41 = vector.broadcast %40 : vector<1x128xf32> to vector<128x128xf32>
    %42 = arith.addf %39, %41 : vector<128x128xf32>
    %c0_39 = arith.constant 0 : index
    %c0_40 = arith.constant 0 : index
    %43 = vector.load %arg10[%c0_39, %c0_40] : memref<128x128xf32, #tpu.memory_space<vmem>>, vector<128x128xf32>
    tpu.vector_store %arg10[%c0_39, %c0_40], %42 {strides = array<i32>} : memref<128x128xf32, #tpu.memory_space<vmem>>, vector<128x128xf32>,
    return
  }
}

</mosaic_0001>

<bundles_post_ra>
// kernel: tpu_custom_call.1
= control target key start
LH: loop header
LB: loop body
LE: loop exit
PB: predicated region body
PF: predicated region fallthrough
CT: control target
= control target key end

     0   :  { %15 = vsyncpa [#allocation5], 0  ;;  %s2132_s0 = inlined_call_operand.hbm [shape: bf16[128,128], index: 0, kind: input, shape index: {}]   ;;  %s2133_s1 = inlined_call_operand.hbm [shape: bf16[128,128], index: 1, kind: input, shape index: {}]   ;;  %s2134_s2 = inlined_call_operand.hbm [shape: bf16[128,128], index: 2, kind: input, shape index: {}]   ;;  %s2135_s3 = inlined_call_operand.vmem [shape: f32[1,128], index: 3, kind: input, shape index: {}]   ;;  %s2136_s4 = inlined_call_operand.hbm [shape: bf16[128,128], index: 4, kind: input, shape index: {}]   ;;  %s2137_s5 = inlined_call_operand.vmem [shape: f32[1,128], index: 5, kind: input, shape index: {}]   ;;  %s2138_s6 = inlined_call_operand.hbm [shape: bf16[128,128], index: 6, kind: input, shape index: {}]   ;;  %s2139_s7 = inlined_call_operand.vmem [shape: f32[1,128], index: 7, kind: input, shape index: {}]   ;;  %s2140_s8 = inlined_call_operand.hbm [shape: bf16[128,128], index: 8, kind: input, shape index: {}]   ;;  %s2141_s9 = inlined_call_operand.hbm [shape: bf16[128,128], index: 9, kind: input, shape index: {}]   ;;  %s2142_s10 = inlined_call_operand.hbm [shape: f32[128,128], index: 10, kind: output, shape index: {}]  }
   0x1   :  { %16 = vsyncpa [#allocation8], 0 }
   0x2   :  { %17 = vsyncpa [#allocation11], 0 }
   0x3   :  { %18 = vsyncpa [#allocation14], 0 }
   0x4   :  { %19 = vsyncpa [#allocation6], 0  ;;  %s1845_s13 = smov [#allocation7]   ;;  %s1846_s15 = smov [#allocation10]  }
   0x5   :  { %s37_s14 = sshll.u32 %s1845_s13, 4  ;;  %s65_s16 = sshll.u32 %s1846_s15, 4  ;;  %s38_s14 = int_to_ptr.vmem [resolvable:$true] %s37_s14  ;;  %s1912_s16 = int_to_ptr.vmem [resolvable:$true] %s65_s16 }
   0x6   :  { %s1657_s19 = scalar_lea.hbm %s2134_s2, 1024 }
   0x7   :  { %p1658_p0 = scmp.ne.s32.totalorder %s2134_s2, %s1657_s19  ;;  %p1661_p1 = scmp.lt.u32.totalorder %s1657_s19, %s2134_s2 }
   0x9   :  { %p1663_p2 = pnand %p1661_p1, %p1658_p0 }
   0xb   :  { %1666 = shalt.err (!%p1663_p2)
}
   0xc   :  { %s1667_s24 = scalar_lea.vmem %s38_s14, 1024  ;;  %p1672_p4 = scmp.lt.s32.totalorder %s38_s14, %s38_s14 }
   0xd   :  { %p1668_p3 = scmp.ne.s32.totalorder %s38_s14, %s1667_s24  ;;  %p1673_p5 = scmp.lt.s32.totalorder %s1667_s24, %s1667_s24 }
   0xf   :  { %p1674_p6 = por %p1673_p5, %p1672_p4 }
  0x11   :  { %p1675_p7 = pnand %p1674_p6, %p1668_p3 }
  0x13   :  { %1678 = shalt.err (!%p1675_p7)
}
  0x14   :  { %s1847_s25 = smov 64   ;;  %s1848_s26 = smov 4  }
  0x15   :  { %43 = dma.hbm_to_vmem [thread:$0]  %s2134_s2, 1024, %s38_s14, [#allocation8], %s1847_s25, %s1847_s25, %s1848_s26  }
  0x16   :  { %s1679_s11 = scalar_lea.hbm %s2138_s6, 1024 }
  0x17   :  { %p1680_p8 = scmp.ne.s32.totalorder %s2138_s6, %s1679_s11  ;;  %p1683_p9 = scmp.lt.u32.totalorder %s1679_s11, %s2138_s6 }
  0x19   :  { %p1685_p10 = pnand %p1683_p9, %p1680_p8 }
  0x1b   :  { %1688 = shalt.err (!%p1685_p10)
}
  0x1c   :  { %s1689_s18 = scalar_lea.vmem %s1912_s16, 1024  ;;  %p1694_p12 = scmp.lt.s32.totalorder %s1912_s16, %s1912_s16 }
  0x1d   :  { %p1690_p11 = scmp.ne.s32.totalorder %s1912_s16, %s1689_s18  ;;  %p1695_p13 = scmp.lt.s32.totalorder %s1689_s18, %s1689_s18 }
  0x1f   :  { %p1696_p0 = por %p1695_p13, %p1694_p12 }
  0x21   :  { %p1697_p1 = pnand %p1696_p0, %p1690_p11 }
  0x23   :  { %1700 = shalt.err (!%p1697_p1)
}
  0x24   :  { %71 = dma.hbm_to_vmem [thread:$0]  %s2138_s6, 1024, %s1912_s16, [#allocation11], %s1847_s25, %s1847_s25, %s1848_s26  }
  0x25   :  { %s1849_s19 = smov [#allocation4]   ;;  %s1850_s21 = smov [#allocation9]  }
  0x26   :  { %s25_s20 = sshll.u32 %s1849_s19, 4  ;;  %s51_s22 = sshll.u32 %s1850_s21, 4  ;;  %s26_s20 = int_to_ptr.vmem [resolvable:$true] %s25_s20  ;;  %s1949_s22 = int_to_ptr.vmem [resolvable:$true] %s51_s22 }
  0x27   :  { %s1701_s27 = scalar_lea.hbm %s2133_s1, 1024 }
  0x28   :  { %p1702_p2 = scmp.ne.s32.totalorder %s2133_s1, %s1701_s27  ;;  %p1705_p3 = scmp.lt.u32.totalorder %s1701_s27, %s2133_s1 }
  0x2a   :  { %p1707_p4 = pnand %p1705_p3, %p1702_p2 }
  0x2c   :  { %1710 = shalt.err (!%p1707_p4)
}
  0x2d   :  { %s1711_s6 = scalar_lea.vmem %s26_s20, 1024  ;;  %p1716_p6 = scmp.lt.s32.totalorder %s26_s20, %s26_s20 }
  0x2e   :  { %p1712_p5 = scmp.ne.s32.totalorder %s26_s20, %s1711_s6  ;;  %p1717_p7 = scmp.lt.s32.totalorder %s1711_s6, %s1711_s6 }
  0x30   :  { %p1718_p8 = por %p1717_p7, %p1716_p6 }
  0x32   :  { %p1719_p9 = pnand %p1718_p8, %p1712_p5 }
  0x34   :  { %1722 = shalt.err (!%p1719_p9)
}
  0x35   :  { %31 = dma.hbm_to_vmem [thread:$0]  %s2133_s1, 1024, %s26_s20, [#allocation5], %s1847_s25, %s1847_s25, %s1848_s26  }
  0x36   :  { %s1723_s17 = scalar_lea.hbm %s2136_s4, 1024 }
  0x37   :  { %p1724_p10 = scmp.ne.s32.totalorder %s2136_s4, %s1723_s17  ;;  %p1727_p11 = scmp.lt.u32.totalorder %s1723_s17, %s2136_s4 }
  0x39   :  { %p1729_p12 = pnand %p1727_p11, %p1724_p10 }
  0x3b   :  { %1732 = shalt.err (!%p1729_p12)
}
  0x3c   :  { %s1733_s21 = scalar_lea.vmem %s1949_s22, 1024  ;;  %p1738_p0 = scmp.lt.s32.totalorder %s1949_s22, %s1949_s22 }
  0x3d   :  { %p1734_p13 = scmp.ne.s32.totalorder %s1949_s22, %s1733_s21  ;;  %p1739_p1 = scmp.lt.s32.totalorder %s1733_s21, %s1733_s21 }
  0x3f   :  { %p1740_p2 = por %p1739_p1, %p1738_p0 }
  0x41   :  { %p1741_p3 = pnand %p1740_p2, %p1734_p13 }
  0x43   :  { %1744 = shalt.err (!%p1741_p3)
}
  0x44   :  { %57 = dma.hbm_to_vmem [thread:$0]  %s2136_s4, 1024, %s1949_s22, [#allocation8], %s1847_s25, %s1847_s25, %s1848_s26  }
  0x45   :  { %s1851_s23 = smov [#allocation12]   ;;  %s1852_s27 = smov [#allocation13]  }
  0x46   :  { %s79_s24 = sshll.u32 %s1851_s23, 4  ;;  %s91_s28 = sshll.u32 %s1852_s27, 4  ;;  %s80_s24 = int_to_ptr.vmem [resolvable:$true] %s79_s24  ;;  %s1986_s28 = int_to_ptr.vmem [resolvable:$true] %s91_s28 }
  0x47   :  { %s1745_s11 = scalar_lea.hbm %s2140_s8, 1024 }
  0x48   :  { %p1746_p4 = scmp.ne.s32.totalorder %s2140_s8, %s1745_s11  ;;  %p1749_p5 = scmp.lt.u32.totalorder %s1745_s11, %s2140_s8 }
  0x4a   :  { %p1751_p6 = pnand %p1749_p5, %p1746_p4 }
  0x4c   :  { %1754 = shalt.err (!%p1751_p6)
}
  0x4d   :  { %s1755_s4 = scalar_lea.vmem %s80_s24, 1024  ;;  %p1760_p8 = scmp.lt.s32.totalorder %s80_s24, %s80_s24 }
  0x4e   :  { %p1756_p7 = scmp.ne.s32.totalorder %s80_s24, %s1755_s4  ;;  %p1761_p9 = scmp.lt.s32.totalorder %s1755_s4, %s1755_s4 }
  0x50   :  { %p1762_p10 = por %p1761_p9, %p1760_p8 }
  0x52   :  { %p1763_p11 = pnand %p1762_p10, %p1756_p7 }
  0x54   :  { %1766 = shalt.err (!%p1763_p11)
}
  0x55   :  { %85 = dma.hbm_to_vmem [thread:$0]  %s2140_s8, 1024, %s80_s24, [#allocation11], %s1847_s25, %s1847_s25, %s1848_s26  }
  0x56   :  { %s1767_s2 = scalar_lea.hbm %s2141_s9, 1024 }
  0x57   :  { %p1768_p12 = scmp.ne.s32.totalorder %s2141_s9, %s1767_s2  ;;  %p1771_p13 = scmp.lt.u32.totalorder %s1767_s2, %s2141_s9 }
  0x59   :  { %p1773_p0 = pnand %p1771_p13, %p1768_p12 }
  0x5b   :  { %1776 = shalt.err (!%p1773_p0)
}
  0x5c   :  { %s1777_s20 = scalar_lea.vmem %s1986_s28, 1024  ;;  %p1782_p2 = scmp.lt.s32.totalorder %s1986_s28, %s1986_s28 }
  0x5d   :  { %p1778_p1 = scmp.ne.s32.totalorder %s1986_s28, %s1777_s20  ;;  %p1783_p3 = scmp.lt.s32.totalorder %s1777_s20, %s1777_s20 }
  0x5f   :  { %p1784_p4 = por %p1783_p3, %p1782_p2 }
  0x61   :  { %p1785_p5 = pnand %p1784_p4, %p1778_p1 }
  0x63   :  { %1788 = shalt.err (!%p1785_p5)
}
  0x64   :  { %97 = dma.hbm_to_vmem [thread:$0]  %s2141_s9, 1024, %s1986_s28, [#allocation14], %s1847_s25, %s1847_s25, %s1848_s26  }
  0x65   :  { %1833 = dma.done.wait [#allocation5], 1024  }
  0x66   :  { %1834 = vsyncadd [#allocation5], 4294966272 }
  0x67   :  { %1835 = dma.done.wait [#allocation8], 2048  }
  0x68   :  { %1836 = vsyncadd [#allocation8], 4294965248 }
  0x69   :  { %1837 = dma.done.wait [#allocation11], 2048  }
  0x6a   :  { %1838 = vsyncadd [#allocation11], 4294965248 }
  0x6b   :  { %1839 = dma.done.wait [#allocation14], 1024  }
  0x6c   :  { %1840 = vsyncadd [#allocation14], 4294966272  ;;  %v1609_v0 = vld [vmem:[#allocation7] sm:$0xff]   ;;  %v1610_v1 = vld [vmem:[#allocation7 + $0x8] sm:$0xff]   ;;  %s1853_s9 = smov [#allocation2]   ;;  %s1789_s27 = scalar_lea.hbm %s2132_s0, 1024 }
  0x6d   :  { %1405 = vmatprep.subr.bf16.mxu0 %v1609_v0  ;;  %v1611_v2 = vld [vmem:[#allocation7 + $0x10] sm:$0xff]   ;;  %v1612_v3 = vld [vmem:[#allocation7 + $0x18] sm:$0xff]   ;;  %v1617_v4 = vld [vmem:[#allocation4] sm:$0xff]   ;;  %s124_s25 = sshll.u32 %s1853_s9, 4  ;;  %p1790_p6 = scmp.ne.s32.totalorder %s2132_s0, %s1789_s27  ;;  %s125_s25 = int_to_ptr.vmem [resolvable:$true] %s124_s25 }
  0x6e   :  { %1406 = vmatpush3.bf16.msra.mxu0 %v1609_v0  ;;  %1421 = vmatprep.mubr.bf16.mxu0 %v1617_v4  ;;  %v1613_v5 = vld [vmem:[#allocation7 + $0x20] sm:$0xff]   ;;  %v1614_v6 = vld [vmem:[#allocation7 + $0x28] sm:$0xff]   ;;  %v1615_v7 = vld [vmem:[#allocation7 + $0x30] sm:$0xff]   ;;  %p1793_p7 = scmp.lt.u32.totalorder %s1789_s27, %s2132_s0 }
  0x6f   :  { %1407 = vmatprep.subr.bf16.mxu0 %v1610_v1  ;;  %v1616_v8 = vld [vmem:[#allocation7 + $0x38] sm:$0xff]   ;;  %v1618_v9 = vld [vmem:[#allocation4 + $0x8] sm:$0xff]   ;;  %v1619_v10 = vld [vmem:[#allocation4 + $0x10] sm:$0xff]  }
  0x70   :  { %v1620_v11 = vld [vmem:[#allocation4 + $0x18] sm:$0xff]   ;;  %v1621_v12 = vld [vmem:[#allocation4 + $0x20] sm:$0xff]   ;;  %v1622_v13 = vld [vmem:[#allocation4 + $0x28] sm:$0xff]   ;;  %p1795_p8 = pnand %p1793_p7, %p1790_p6 }
  0x71   :  { %v1623_v14 = vld [vmem:[#allocation4 + $0x30] sm:$0xff]   ;;  %v1624_v15 = vld [vmem:[#allocation4 + $0x38] sm:$0xff]  }
  0x72   :  { %1408 = vmatpush3.bf16.msra.mxu0 %v1610_v1 }
  0x73   :  { %1409 = vmatprep.subr.bf16.mxu0 %v1611_v2 }
  0x76   :  { %1410 = vmatpush3.bf16.msra.mxu0 %v1611_v2 }
  0x77   :  { %1411 = vmatprep.subr.bf16.mxu0 %v1612_v3 }
  0x7a   :  { %1412 = vmatpush3.bf16.msra.mxu0 %v1612_v3 }
  0x7b   :  { %1413 = vmatprep.subr.bf16.mxu0 %v1613_v5 }
  0x7e   :  { %1414 = vmatpush3.bf16.msra.mxu0 %v1613_v5 }
  0x7f   :  { %1415 = vmatprep.subr.bf16.mxu0 %v1614_v6 }
  0x82   :  { %1416 = vmatpush3.bf16.msra.mxu0 %v1614_v6 }
  0x83   :  { %1417 = vmatprep.subr.bf16.mxu0 %v1615_v7 }
  0x86   :  { %1418 = vmatpush3.bf16.msra.mxu0 %v1615_v7 }
  0x87   :  { %1419 = vmatprep.subr.bf16.mxu0 %v1616_v8 }
  0x8a   :  { %1420 = vmatpush3.bf16.msra.mxu0 %v1616_v8 }
  0x8d   :  { %1422 = vmatmul.mubr.bf16.vlgmr.msra.gmra.mrb[0].mxu0 %v1618_v9 }
  0x8e   :  { %1425 = vmatprep.mubr.bf16.mxu0 %v1619_v10 }
  0x95   :  { %1426 = vmatmul.mubr.bf16.gmra.mrb[4].mxu0 %v1620_v11 }
  0x96   :  { %1429 = vmatprep.mubr.bf16.mxu0 %v1621_v12 }
  0x9d   :  { %1430 = vmatmul.mubr.bf16.gmra.mrb[8].mxu0 %v1622_v13 }
  0x9e   :  { %1433 = vmatprep.mubr.bf16.mxu0 %v1623_v14 }
  0xa5   :  { %1434 = vmatmul.mubr.bf16.gmra.mrb[12].mxu0 %v1624_v15 }
  0xa6   :  { %1798 = shalt.err (!%p1795_p8)  }
  0xa7   :  { %s1799_s6 = scalar_lea.vmem %s125_s25, 1024  ;;  %p1804_p10 = scmp.lt.s32.totalorder %s125_s25, %s125_s25 }
  0xa8   :  { %p1800_p9 = scmp.ne.s32.totalorder %s125_s25, %s1799_s6  ;;  %p1805_p11 = scmp.lt.s32.totalorder %s1799_s6, %s1799_s6 }
  0xaa   :  { %p1806_p12 = por %p1805_p11, %p1804_p10 }
  0xac   :  { %p1807_p13 = pnand %p1806_p12, %p1800_p9 }
  0xae   :  { %1810 = shalt.err (!%p1807_p13)  }
  0xaf   :  { %127 = dma.hbm_to_vmem [thread:$0]  %s2132_s0, 1024, %s125_s25, [#allocation3] }
 0x160   :  { %v1423_v16 = vpop.f32.mrb[0].mxu0 }
 0x161   :  { %v290_v17 = vpop.f32.mrb[1].mxu0 }
 0x162   :  { %v1424_v18 = vpop.f32.mrb[2].mxu0 }
 0x163   :  { %v354_v19 = vpack.c.bf16 %v1424_v18, %v1423_v16  ;;  %v293_v20 = vpop.f32.mrb[3].mxu0 }
 0x164   :  { %v353_v21 = vpack.c.bf16 %v293_v20, %v290_v17 }
 0x166   :  { %1437 = vmatprep.subr.bf16.mxu1 %v353_v21 }
 0x168   :  { %v1427_v22 = vpop.f32.mrb[4].mxu0 }
 0x169   :  { %v306_v23 = vpop.f32.mrb[5].mxu0 }
 0x16a   :  { %v1428_v24 = vpop.f32.mrb[6].mxu0 }
 0x16b   :  { %v356_v25 = vpack.c.bf16 %v1428_v24, %v1427_v22  ;;  %v309_v26 = vpop.f32.mrb[7].mxu0 }
 0x16c   :  { %v355_v27 = vpack.c.bf16 %v309_v26, %v306_v23 }
 0x170   :  { %v1431_v28 = vpop.f32.mrb[8].mxu0 }
 0x171   :  { %v322_v29 = vpop.f32.mrb[9].mxu0 }
 0x172   :  { %v1432_v30 = vpop.f32.mrb[10].mxu0 }
 0x173   :  { %v358_v31 = vpack.c.bf16 %v1432_v30, %v1431_v28  ;;  %v325_v32 = vpop.f32.mrb[11].mxu0 }
 0x174   :  { %v357_v33 = vpack.c.bf16 %v325_v32, %v322_v29 }
 0x178   :  { %v1435_v34 = vpop.f32.mrb[12].mxu0 }
 0x179   :  { %v338_v35 = vpop.f32.mrb[13].mxu0 }
 0x17a   :  { %v1436_v36 = vpop.f32.mrb[14].mxu0 }
 0x17b   :  { %v360_v37 = vpack.c.bf16 %v1436_v36, %v1435_v34  ;;  %v341_v38 = vpop.f32.mrb[15].mxu0 }
 0x17c   :  { %v359_v39 = vpack.c.bf16 %v341_v38, %v338_v35 }
 0x17d   :  { %1841 = dma.done.wait [#allocation3], 1024 }
 0x17e   :  { %1842 = vsyncadd [#allocation3], 4294966272  ;;  %1438 = vmatpush3.bf16.msra.mxu1 %v353_v21  ;;  %v2035_v40 = vld [vmem:[#allocation2] sm:$0xff]  ;;  %v1626_v42 = vld [vmem:[#allocation9 + $0x8] sm:$0xff]  }
 0x17f   :  { %1439 = vmatprep.subr.bf16.mxu1 %v354_v19  ;;  %1453 = vmatprep.mubr.bf16.mxu1 %v2035_v40  ;;  %v1625_v41 = vld [vmem:[#allocation9] sm:$0xff]   ;;  %v1627_v43 = vld [vmem:[#allocation9 + $0x10] sm:$0xff]   ;;  %v1628_v44 = vld [vmem:[#allocation9 + $0x18] sm:$0xff]  }
 0x180   :  { %1469 = vmatprep.subr.bf16.mxu0 %v1625_v41  ;;  %v1629_v45 = vld [vmem:[#allocation9 + $0x20] sm:$0xff]   ;;  %v2038_v46 = vld [vmem:[#allocation2 + $0x8] sm:$0xff]  ;;  %v2040_v47 = vld [vmem:[#allocation2 + $0x10] sm:$0xff] }
 0x181   :  { %1470 = vmatpush3.bf16.msra.mxu0 %v1625_v41  ;;  %v2044_v48 = vld [vmem:[#allocation2 + $0x18] sm:$0xff]  ;;  %v2046_v49 = vld [vmem:[#allocation2 + $0x20] sm:$0xff]  ;;  %v2050_v50 = vld [vmem:[#allocation2 + $0x28] sm:$0xff] }
 0x182   :  { %1440 = vmatpush3.bf16.msra.mxu1 %v354_v19  ;;  %1471 = vmatprep.subr.bf16.mxu0 %v1626_v42  ;;  %v2052_v51 = vld [vmem:[#allocation2 + $0x30] sm:$0xff]  ;;  %v2056_v52 = vld [vmem:[#allocation2 + $0x38] sm:$0xff]  ;;  %v1630_v53 = vld [vmem:[#allocation9 + $0x28] sm:$0xff]  }
 0x183   :  { %1441 = vmatprep.subr.bf16.mxu1 %v355_v27  ;;  %v1631_v54 = vld [vmem:[#allocation9 + $0x30] sm:$0xff]   ;;  %v1632_v55 = vld [vmem:[#allocation9 + $0x38] sm:$0xff]   ;;  %v2063_v56 = vld [vmem:[%s2135_s3] ss:$0 sm:$0xff] }
 0x184   :  { %v1633_v5 = vld [vmem:[#allocation12] sm:$0xff]   ;;  %v1634_v7 = vld [vmem:[#allocation12 + $0x8] sm:$0xff]   ;;  %v1635_v23 = vld [vmem:[#allocation12 + $0x10] sm:$0xff]  }
 0x185   :  { %1472 = vmatpush3.bf16.msra.mxu0 %v1626_v42  ;;  %v1637_v42 = vld [vmem:[#allocation12 + $0x20] sm:$0xff]  }
 0x186   :  { %1442 = vmatpush3.bf16.msra.mxu1 %v355_v27  ;;  %1473 = vmatprep.subr.bf16.mxu0 %v1627_v43 }
 0x187   :  { %1443 = vmatprep.subr.bf16.mxu1 %v356_v25 }
 0x189   :  { %1474 = vmatpush3.bf16.msra.mxu0 %v1627_v43 }
 0x18a   :  { %1444 = vmatpush3.bf16.msra.mxu1 %v356_v25  ;;  %1475 = vmatprep.subr.bf16.mxu0 %v1628_v44  ;;  %v1636_v25 = vld [vmem:[#allocation12 + $0x18] sm:$0xff]  }
 0x18b   :  { %1445 = vmatprep.subr.bf16.mxu1 %v357_v33 }
 0x18d   :  { %1476 = vmatpush3.bf16.msra.mxu0 %v1628_v44  ;;  %v1638_v44 = vld [vmem:[#allocation12 + $0x28] sm:$0xff]  }
 0x18e   :  { %1446 = vmatpush3.bf16.msra.mxu1 %v357_v33  ;;  %1477 = vmatprep.subr.bf16.mxu0 %v1629_v45 }
 0x18f   :  { %1447 = vmatprep.subr.bf16.mxu1 %v358_v31 }
 0x191   :  { %1478 = vmatpush3.bf16.msra.mxu0 %v1629_v45 }
 0x192   :  { %1448 = vmatpush3.bf16.msra.mxu1 %v358_v31  ;;  %1479 = vmatprep.subr.bf16.mxu0 %v1630_v53 }
 0x193   :  { %1449 = vmatprep.subr.bf16.mxu1 %v359_v39 }
 0x195   :  { %1480 = vmatpush3.bf16.msra.mxu0 %v1630_v53 }
 0x196   :  { %1450 = vmatpush3.bf16.msra.mxu1 %v359_v39  ;;  %1481 = vmatprep.subr.bf16.mxu0 %v1631_v54 }
 0x197   :  { %1451 = vmatprep.subr.bf16.mxu1 %v360_v37 }
 0x199   :  { %1482 = vmatpush3.bf16.msra.mxu0 %v1631_v54 }
 0x19a   :  { %1452 = vmatpush3.bf16.msra.mxu1 %v360_v37  ;;  %1483 = vmatprep.subr.bf16.mxu0 %v1632_v55 }
 0x19d   :  { %1454 = vmatmul.mubr.bf16.vlgmr.msra.gmra.mrb[0].mxu1 %v2038_v46  ;;  %1484 = vmatpush3.bf16.msra.mxu0 %v1632_v55 }
 0x19e   :  { %1457 = vmatprep.mubr.bf16.mxu1 %v2040_v47 }
 0x1a5   :  { %1458 = vmatmul.mubr.bf16.gmra.mrb[4].mxu1 %v2044_v48 }
 0x1a6   :  { %1461 = vmatprep.mubr.bf16.mxu1 %v2046_v49 }
 0x1ad   :  { %1462 = vmatmul.mubr.bf16.gmra.mrb[8].mxu1 %v2050_v50 }
 0x1ae   :  { %1465 = vmatprep.mubr.bf16.mxu1 %v2052_v51 }
 0x1b5   :  { %1466 = vmatmul.mubr.bf16.gmra.mrb[12].mxu1 %v2056_v52 }
 0x1b6   :  { %1517 = vmatprep.mubr.bf16.mxu1 %v2035_v40 }
 0x270   :  { %v1455_v57 = vpop.f32.mrb[0].mxu1 }
 0x271   :  { %v423_v58 = vadd.f32 %v1455_v57, %v2063_v56  ;;  %v414_v59 = vpop.f32.mrb[1].mxu1 }
 0x272   :  { %v415_v60 = vadd.f32 %v2063_v56, %v414_v59  ;;  %v1456_v61 = vpop.f32.mrb[2].mxu1 }
 0x273   :  { %v426_v62 = vadd.f32 %v1456_v61, %v2063_v56  ;;  %v417_v63 = vpop.f32.mrb[3].mxu1  ;;  %v479_v1 = vmax.f32 %v423_v58, 0.0 }
 0x274   :  { %v418_v0 = vadd.f32 %v2063_v56, %v417_v63  ;;  %v477_v3 = vmax.f32 %v415_v60, 0.0 }
 0x275   :  { %v480_v2 = vmax.f32 %v426_v62, 0.0 }
 0x276   :  { %v478_v4 = vmax.f32 %v418_v0, 0.0 }
 0x277   :  { %v494_v6 = vpack.c.bf16 %v480_v2, %v479_v1 }
 0x278   :  { %v1459_v8 = vpop.f32.mrb[4].mxu1  ;;  %v493_v9 = vpack.c.bf16 %v478_v4, %v477_v3  ;;  %v1639_v4 = vld [vmem:[#allocation12 + $0x30] sm:$0xff]  }
 0x279   :  { %v439_v10 = vadd.f32 %v1459_v8, %v2063_v56  ;;  %v430_v11 = vpop.f32.mrb[5].mxu1  ;;  %v566_v17 = vmul.bf16 %v1634_v7, %v494_v6  ;;  %v1640_v6 = vld [vmem:[#allocation12 + $0x38] sm:$0xff]  }
 0x27a   :  { %v431_v12 = vadd.f32 %v2063_v56, %v430_v11  ;;  %v1460_v13 = vpop.f32.mrb[6].mxu1  ;;  %v565_v14 = vmul.bf16 %v1633_v5, %v493_v9  ;;  %v1642_v11 = vld [vmem:[#allocation10 + $0x8] sm:$0xff]  }
 0x27b   :  { %v442_v15 = vadd.f32 %v1460_v13, %v2063_v56  ;;  %v433_v16 = vpop.f32.mrb[7].mxu1  ;;  %v483_v19 = vmax.f32 %v439_v10, 0.0  ;;  %v1641_v10 = vld [vmem:[#allocation10] sm:$0xff]  }
 0x27c   :  { %v434_v18 = vadd.f32 %v2063_v56, %v433_v16  ;;  %1485 = vmatprep.mubr.bf16.mxu0 %v565_v14  ;;  %v481_v21 = vmax.f32 %v431_v12, 0.0  ;;  %1533 = vmatprep.subr.bf16.mxu0 %v1641_v10  ;;  %v1644_v12 = vld [vmem:[#allocation10 + $0x18] sm:$0xff]   ;;  %v1645_v13 = vld [vmem:[#allocation10 + $0x20] sm:$0xff]  }
 0x27d   :  { %v484_v20 = vmax.f32 %v442_v15, 0.0  ;;  %1486 = vmatmul.mubr.bf16.vlgmr.msra.gmra.mrb[16].mxu0 %v566_v17 }
 0x27e   :  { %v482_v22 = vmax.f32 %v434_v18, 0.0  ;;  %1534 = vmatpush3.bf16.msra.mxu0 %v1641_v10 }
 0x27f   :  { %v496_v24 = vpack.c.bf16 %v484_v20, %v483_v19  ;;  %1535 = vmatprep.subr.bf16.mxu0 %v1642_v11 }
 0x280   :  { %v495_v26 = vpack.c.bf16 %v482_v22, %v481_v21  ;;  %v1463_v27 = vpop.f32.mrb[8].mxu1 }
 0x281   :  { %v455_v28 = vadd.f32 %v1463_v27, %v2063_v56  ;;  %v446_v29 = vpop.f32.mrb[9].mxu1  ;;  %v568_v35 = vmul.bf16 %v1636_v25, %v496_v24 }
 0x282   :  { %v447_v30 = vadd.f32 %v2063_v56, %v446_v29  ;;  %v1464_v31 = vpop.f32.mrb[10].mxu1  ;;  %v567_v32 = vmul.bf16 %v1635_v23, %v495_v26  ;;  %1536 = vmatpush3.bf16.msra.mxu0 %v1642_v11 }
 0x283   :  { %v458_v33 = vadd.f32 %v1464_v31, %v2063_v56  ;;  %v449_v34 = vpop.f32.mrb[11].mxu1  ;;  %v487_v37 = vmax.f32 %v455_v28, 0.0 }
 0x284   :  { %v450_v36 = vadd.f32 %v2063_v56, %v449_v34  ;;  %1489 = vmatprep.mubr.bf16.mxu0 %v567_v32  ;;  %v485_v39 = vmax.f32 %v447_v30, 0.0 }
 0x285   :  { %v488_v38 = vmax.f32 %v458_v33, 0.0  ;;  %1490 = vmatmul.mubr.bf16.gmra.mrb[20].mxu0 %v568_v35 }
 0x286   :  { %v486_v41 = vmax.f32 %v450_v36, 0.0 }
 0x287   :  { %v498_v43 = vpack.c.bf16 %v488_v38, %v487_v37  ;;  %v1646_v38 = vld [vmem:[#allocation10 + $0x28] sm:$0xff]  }
 0x288   :  { %v497_v45 = vpack.c.bf16 %v486_v41, %v485_v39  ;;  %v1467_v53 = vpop.f32.mrb[12].mxu1  ;;  %v1648_v39 = vld [vmem:[#allocation10 + $0x30] sm:$0xff]   ;;  %v1649_v41 = vld [vmem:[#allocation10 + $0x38] sm:$0xff]  }
 0x289   :  { %v471_v54 = vadd.f32 %v1467_v53, %v2063_v56  ;;  %v462_v55 = vpop.f32.mrb[13].mxu1  ;;  %v570_v62 = vmul.bf16 %v1638_v44, %v498_v43 }
 0x28a   :  { %v463_v57 = vadd.f32 %v2063_v56, %v462_v55  ;;  %v1468_v58 = vpop.f32.mrb[14].mxu1  ;;  %v569_v59 = vmul.bf16 %v1637_v42, %v497_v45  ;;  %v2092_v42 = vld [vmem:[%s2137_s5] ss:$0 sm:$0xff] }
 0x28b   :  { %v474_v60 = vadd.f32 %v1468_v58, %v2063_v56  ;;  %v465_v61 = vpop.f32.mrb[15].mxu1  ;;  %v491_v0 = vmax.f32 %v471_v54, 0.0 }
 0x28c   :  { %v466_v63 = vadd.f32 %v2063_v56, %v465_v61  ;;  %1493 = vmatprep.mubr.bf16.mxu0 %v569_v59  ;;  %v489_v2 = vmax.f32 %v463_v57, 0.0  ;;  %v1643_v56 = vld [vmem:[#allocation10 + $0x10] sm:$0xff]  }
 0x28d   :  { %v492_v1 = vmax.f32 %v474_v60, 0.0  ;;  %1494 = vmatmul.mubr.bf16.gmra.mrb[24].mxu0 %v570_v62  ;;  %1537 = vmatprep.subr.bf16.mxu0 %v1643_v56  ;;  %v1650_v62 = vld [vmem:[#allocation13] sm:$0xff]  }
 0x28e   :  { %v490_v3 = vmax.f32 %v466_v63, 0.0  ;;  %1538 = vmatpush3.bf16.msra.mxu0 %v1643_v56 }
 0x28f   :  { %v500_v5 = vpack.c.bf16 %v492_v1, %v491_v0  ;;  %1539 = vmatprep.subr.bf16.mxu0 %v1644_v12  ;;  %v1647_v0 = vld [vmem:[#allocation13 + $0x8] sm:$0xff]  }
 0x290   :  { %v499_v7 = vpack.c.bf16 %v490_v3, %v489_v2 }
 0x291   :  { %v572_v9 = vmul.bf16 %v1640_v6, %v500_v5 }
 0x292   :  { %v571_v8 = vmul.bf16 %v1639_v4, %v499_v7  ;;  %1540 = vmatpush3.bf16.msra.mxu0 %v1644_v12 }
 0x293   :  { %1541 = vmatprep.subr.bf16.mxu0 %v1645_v13 }
 0x294   :  { %1497 = vmatprep.mubr.bf16.mxu0 %v571_v8 }
 0x295   :  { %1498 = vmatmul.mubr.bf16.gmra.mrb[28].mxu0 %v572_v9 }
 0x296   :  { %1542 = vmatpush3.bf16.msra.mxu0 %v1645_v13 }
 0x297   :  { %1543 = vmatprep.subr.bf16.mxu0 %v1646_v38 }
 0x29a   :  { %1544 = vmatpush3.bf16.msra.mxu0 %v1646_v38 }
 0x29b   :  { %1545 = vmatprep.subr.bf16.mxu0 %v1648_v39 }
 0x29e   :  { %1546 = vmatpush3.bf16.msra.mxu0 %v1648_v39 }
 0x29f   :  { %1547 = vmatprep.subr.bf16.mxu0 %v1649_v41 }
 0x2a2   :  { %1548 = vmatpush3.bf16.msra.mxu0 %v1649_v41 }
 0x350   :  { %v1487_v14 = vpop.f32.mrb[16].mxu0 }
 0x351   :  { %v671_v15 = vpop.f32.mrb[17].mxu0 }
 0x352   :  { %v1488_v16 = vpop.f32.mrb[18].mxu0 }
 0x353   :  { %v735_v17 = vpack.c.bf16 %v1488_v16, %v1487_v14  ;;  %v674_v18 = vpop.f32.mrb[19].mxu0 }
 0x354   :  { %v734_v19 = vpack.c.bf16 %v674_v18, %v671_v15  ;;  %v1651_v15 = vld [vmem:[#allocation13 + $0x10] sm:$0xff]  }
 0x356   :  { %1501 = vmatprep.subr.bf16.mxu1 %v734_v19 }
 0x357   :  { %1502 = vmatpush3.bf16.msra.mxu1 %v734_v19 }
 0x358   :  { %v1491_v20 = vpop.f32.mrb[20].mxu0  ;;  %1503 = vmatprep.subr.bf16.mxu1 %v735_v17 }
 0x359   :  { %v687_v21 = vpop.f32.mrb[21].mxu0 }
 0x35a   :  { %v1492_v22 = vpop.f32.mrb[22].mxu0 }
 0x35b   :  { %v737_v23 = vpack.c.bf16 %v1492_v22, %v1491_v20  ;;  %v690_v24 = vpop.f32.mrb[23].mxu0  ;;  %1504 = vmatpush3.bf16.msra.mxu1 %v735_v17  ;;  %v1652_v17 = vld [vmem:[#allocation13 + $0x18] sm:$0xff]  }
 0x35c   :  { %v736_v25 = vpack.c.bf16 %v690_v24, %v687_v21 }
 0x35e   :  { %1505 = vmatprep.subr.bf16.mxu1 %v736_v25 }
 0x35f   :  { %1506 = vmatpush3.bf16.msra.mxu1 %v736_v25 }
 0x360   :  { %v1495_v26 = vpop.f32.mrb[24].mxu0  ;;  %1507 = vmatprep.subr.bf16.mxu1 %v737_v23 }
 0x361   :  { %v703_v27 = vpop.f32.mrb[25].mxu0 }
 0x362   :  { %v1496_v28 = vpop.f32.mrb[26].mxu0 }
 0x363   :  { %v739_v29 = vpack.c.bf16 %v1496_v28, %v1495_v26  ;;  %v706_v30 = vpop.f32.mrb[27].mxu0  ;;  %1508 = vmatpush3.bf16.msra.mxu1 %v737_v23 }
 0x364   :  { %v738_v31 = vpack.c.bf16 %v706_v30, %v703_v27 }
 0x366   :  { %1509 = vmatprep.subr.bf16.mxu1 %v738_v31 }
 0x367   :  { %1510 = vmatpush3.bf16.msra.mxu1 %v738_v31 }
 0x368   :  { %v1499_v32 = vpop.f32.mrb[28].mxu0  ;;  %1511 = vmatprep.subr.bf16.mxu1 %v739_v29 }
 0x369   :  { %v719_v33 = vpop.f32.mrb[29].mxu0 }
 0x36a   :  { %v1500_v34 = vpop.f32.mrb[30].mxu0 }
 0x36b   :  { %v741_v35 = vpack.c.bf16 %v1500_v34, %v1499_v32  ;;  %v722_v36 = vpop.f32.mrb[31].mxu0  ;;  %1512 = vmatpush3.bf16.msra.mxu1 %v739_v29 }
 0x36c   :  { %v740_v37 = vpack.c.bf16 %v722_v36, %v719_v33  ;;  %v1653_v33 = vld [vmem:[#allocation13 + $0x20] sm:$0xff]  }
 0x36e   :  { %1513 = vmatprep.subr.bf16.mxu1 %v740_v37 }
 0x36f   :  { %1514 = vmatpush3.bf16.msra.mxu1 %v740_v37 }
 0x370   :  { %1515 = vmatprep.subr.bf16.mxu1 %v741_v35 }
 0x373   :  { %1516 = vmatpush3.bf16.msra.mxu1 %v741_v35  ;;  %v1654_v35 = vld [vmem:[#allocation13 + $0x28] sm:$0xff]  }
 0x376   :  { %1518 = vmatmul.mubr.bf16.vlgmr.msra.gmra.mrb[16].mxu1 %v2038_v46 }
 0x377   :  { %1521 = vmatprep.mubr.bf16.mxu1 %v2040_v47 }
 0x37e   :  { %1522 = vmatmul.mubr.bf16.gmra.mrb[20].mxu1 %v2044_v48 }
 0x37f   :  { %1525 = vmatprep.mubr.bf16.mxu1 %v2046_v49 }
 0x386   :  { %1526 = vmatmul.mubr.bf16.gmra.mrb[24].mxu1 %v2050_v50 }
 0x387   :  { %1529 = vmatprep.mubr.bf16.mxu1 %v2052_v51 }
 0x38e   :  { %1530 = vmatmul.mubr.bf16.gmra.mrb[28].mxu1 %v2056_v52 }
 0x38f   :  { %1581 = vmatprep.mubr.bf16.mxu1 %v2035_v40 }
 0x449   :  { %v1519_v43 = vpop.f32.mrb[16].mxu1 }
 0x44a   :  { %v792_v44 = vadd.f32 %v1519_v43, %v2092_v42  ;;  %v783_v45 = vpop.f32.mrb[17].mxu1 }
 0x44b   :  { %v784_v40 = vadd.f32 %v2092_v42, %v783_v45  ;;  %v1520_v53 = vpop.f32.mrb[18].mxu1 }
 0x44c   :  { %v795_v54 = vadd.f32 %v1520_v53, %v2092_v42  ;;  %v786_v55 = vpop.f32.mrb[19].mxu1  ;;  %v848_v58 = vmax.f32 %v792_v44, 0.0 }
 0x44d   :  { %v787_v57 = vadd.f32 %v2092_v42, %v786_v55  ;;  %v846_v60 = vmax.f32 %v784_v40, 0.0 }
 0x44e   :  { %v849_v59 = vmax.f32 %v795_v54, 0.0 }
 0x44f   :  { %v847_v61 = vmax.f32 %v787_v57, 0.0 }
 0x450   :  { %v863_v63 = vpack.c.bf16 %v849_v59, %v848_v58 }
 0x451   :  { %v862_v1 = vpack.c.bf16 %v847_v61, %v846_v60  ;;  %v1523_v2 = vpop.f32.mrb[20].mxu1  ;;  %v1655_v60 = vld [vmem:[#allocation13 + $0x30] sm:$0xff]  }
 0x452   :  { %v808_v3 = vadd.f32 %v1523_v2, %v2092_v42  ;;  %v799_v4 = vpop.f32.mrb[21].mxu1  ;;  %v935_v8 = vmul.bf16 %v1647_v0, %v863_v63 }
 0x453   :  { %v800_v5 = vadd.f32 %v2092_v42, %v799_v4  ;;  %v1524_v6 = vpop.f32.mrb[22].mxu1  ;;  %v934_v7 = vmul.bf16 %v1650_v62, %v862_v1  ;;  %v1656_v62 = vld [vmem:[#allocation13 + $0x38] sm:$0xff]  }
 0x454   :  { %v811_v9 = vadd.f32 %v1524_v6, %v2092_v42  ;;  %v802_v10 = vpop.f32.mrb[23].mxu1  ;;  %v852_v56 = vmax.f32 %v808_v3, 0.0 }
 0x455   :  { %v803_v11 = vadd.f32 %v2092_v42, %v802_v10  ;;  %1549 = vmatprep.mubr.bf16.mxu0 %v934_v7  ;;  %v850_v13 = vmax.f32 %v800_v5, 0.0 }
 0x456   :  { %v853_v12 = vmax.f32 %v811_v9, 0.0  ;;  %1550 = vmatmul.mubr.bf16.vlgmr.msra.gmra.mrb[32].mxu0 %v935_v8 }
 0x457   :  { %v851_v14 = vmax.f32 %v803_v11, 0.0 }
 0x458   :  { %v865_v16 = vpack.c.bf16 %v853_v12, %v852_v56 }
 0x459   :  { %v864_v18 = vpack.c.bf16 %v851_v14, %v850_v13  ;;  %v1527_v19 = vpop.f32.mrb[24].mxu1 }
 0x45a   :  { %v824_v20 = vadd.f32 %v1527_v19, %v2092_v42  ;;  %v815_v21 = vpop.f32.mrb[25].mxu1  ;;  %v937_v27 = vmul.bf16 %v1652_v17, %v865_v16 }
 0x45b   :  { %v816_v22 = vadd.f32 %v2092_v42, %v815_v21  ;;  %v1528_v23 = vpop.f32.mrb[26].mxu1  ;;  %v936_v24 = vmul.bf16 %v1651_v15, %v864_v18 }
 0x45c   :  { %v827_v25 = vadd.f32 %v1528_v23, %v2092_v42  ;;  %v818_v26 = vpop.f32.mrb[27].mxu1  ;;  %v856_v29 = vmax.f32 %v824_v20, 0.0 }
 0x45d   :  { %v819_v28 = vadd.f32 %v2092_v42, %v818_v26  ;;  %1553 = vmatprep.mubr.bf16.mxu0 %v936_v24  ;;  %v854_v31 = vmax.f32 %v816_v22, 0.0  ;;  %v1307_v24 = vld [vmem:[%s2139_s7] ss:$0 sm:$0xff]  ;;  %s1854_s7 = smov [#allocation15]  }
 0x45e   :  { %v857_v30 = vmax.f32 %v827_v25, 0.0  ;;  %1554 = vmatmul.mubr.bf16.gmra.mrb[36].mxu0 %v937_v27  ;;  %s1236_s15 = sshll.u32 %s1854_s7, 4  ;;  %s1237_s15 = int_to_ptr.vmem [resolvable:$true] %s1236_s15 }
 0x45f   :  { %v855_v32 = vmax.f32 %v819_v28, 0.0  ;;  %s1811_s17 = scalar_lea.vmem %s1237_s15, 2048  ;;  %p1816_p1 = scmp.lt.s32.totalorder %s1237_s15, %s1237_s15 }
 0x460   :  { %v867_v34 = vpack.c.bf16 %v857_v30, %v856_v29  ;;  %p1812_p0 = scmp.ne.s32.totalorder %s1237_s15, %s1811_s17  ;;  %p1817_p2 = scmp.lt.s32.totalorder %s1811_s17, %s1811_s17 }
 0x461   :  { %v866_v36 = vpack.c.bf16 %v855_v32, %v854_v31  ;;  %v1531_v37 = vpop.f32.mrb[28].mxu1 }
 0x462   :  { %v840_v38 = vadd.f32 %v1531_v37, %v2092_v42  ;;  %v831_v39 = vpop.f32.mrb[29].mxu1  ;;  %v939_v53 = vmul.bf16 %v1654_v35, %v867_v34  ;;  %p1818_p3 = por %p1817_p2, %p1816_p1 }
 0x463   :  { %v832_v41 = vadd.f32 %v2092_v42, %v831_v39  ;;  %v1532_v43 = vpop.f32.mrb[30].mxu1  ;;  %v938_v44 = vmul.bf16 %v1653_v33, %v866_v36 }
 0x464   :  { %v843_v45 = vadd.f32 %v1532_v43, %v2092_v42  ;;  %v834_v40 = vpop.f32.mrb[31].mxu1  ;;  %v860_v55 = vmax.f32 %v840_v38, 0.0  ;;  %p1819_p4 = pnand %p1818_p3, %p1812_p0 }
 0x465   :  { %v835_v54 = vadd.f32 %v2092_v42, %v834_v40  ;;  %1557 = vmatprep.mubr.bf16.mxu0 %v938_v44  ;;  %v858_v58 = vmax.f32 %v832_v41, 0.0 }
 0x466   :  { %v861_v57 = vmax.f32 %v843_v45, 0.0  ;;  %1558 = vmatmul.mubr.bf16.gmra.mrb[40].mxu0 %v939_v53 }
 0x467   :  { %v859_v59 = vmax.f32 %v835_v54, 0.0 }
 0x468   :  { %v869_v61 = vpack.c.bf16 %v861_v57, %v860_v55 }
 0x469   :  { %v868_v63 = vpack.c.bf16 %v859_v59, %v858_v58 }
 0x46a   :  { %v941_v1 = vmul.bf16 %v1656_v62, %v869_v61 }
 0x46b   :  { %v940_v0 = vmul.bf16 %v1655_v60, %v868_v63 }
 0x46d   :  { %1561 = vmatprep.mubr.bf16.mxu0 %v940_v0 }
 0x46e   :  { %1562 = vmatmul.mubr.bf16.gmra.mrb[44].mxu0 %v941_v1 }
 0x529   :  { %v1551_v2 = vpop.f32.mrb[32].mxu0 }
 0x52a   :  { %v1040_v3 = vpop.f32.mrb[33].mxu0 }
 0x52b   :  { %v1552_v4 = vpop.f32.mrb[34].mxu0 }
 0x52c   :  { %v1104_v5 = vpack.c.bf16 %v1552_v4, %v1551_v2  ;;  %v1043_v6 = vpop.f32.mrb[35].mxu0 }
 0x52d   :  { %v1103_v42 = vpack.c.bf16 %v1043_v6, %v1040_v3 }
 0x52f   :  { %1565 = vmatprep.subr.bf16.mxu1 %v1103_v42 }
 0x530   :  { %1566 = vmatpush3.bf16.msra.mxu1 %v1103_v42 }
 0x531   :  { %v1555_v7 = vpop.f32.mrb[36].mxu0  ;;  %1567 = vmatprep.subr.bf16.mxu1 %v1104_v5 }
 0x532   :  { %v1056_v8 = vpop.f32.mrb[37].mxu0 }
 0x533   :  { %v1556_v9 = vpop.f32.mrb[38].mxu0 }
 0x534   :  { %v1106_v10 = vpack.c.bf16 %v1556_v9, %v1555_v7  ;;  %v1059_v11 = vpop.f32.mrb[39].mxu0  ;;  %1568 = vmatpush3.bf16.msra.mxu1 %v1104_v5 }
 0x535   :  { %v1105_v56 = vpack.c.bf16 %v1059_v11, %v1056_v8 }
 0x537   :  { %1569 = vmatprep.subr.bf16.mxu1 %v1105_v56 }
 0x538   :  { %1570 = vmatpush3.bf16.msra.mxu1 %v1105_v56 }
 0x539   :  { %v1559_v12 = vpop.f32.mrb[40].mxu0  ;;  %1571 = vmatprep.subr.bf16.mxu1 %v1106_v10 }
 0x53a   :  { %v1072_v13 = vpop.f32.mrb[41].mxu0 }
 0x53b   :  { %v1560_v14 = vpop.f32.mrb[42].mxu0 }
 0x53c   :  { %v1108_v15 = vpack.c.bf16 %v1560_v14, %v1559_v12  ;;  %v1075_v16 = vpop.f32.mrb[43].mxu0  ;;  %1572 = vmatpush3.bf16.msra.mxu1 %v1106_v10 }
 0x53d   :  { %v1107_v17 = vpack.c.bf16 %v1075_v16, %v1072_v13 }
 0x53f   :  { %1573 = vmatprep.subr.bf16.mxu1 %v1107_v17 }
 0x540   :  { %1574 = vmatpush3.bf16.msra.mxu1 %v1107_v17 }
 0x541   :  { %v1563_v18 = vpop.f32.mrb[44].mxu0  ;;  %1575 = vmatprep.subr.bf16.mxu1 %v1108_v15 }
 0x542   :  { %v1088_v19 = vpop.f32.mrb[45].mxu0 }
 0x543   :  { %v1564_v20 = vpop.f32.mrb[46].mxu0 }
 0x544   :  { %v1110_v21 = vpack.c.bf16 %v1564_v20, %v1563_v18  ;;  %v1091_v22 = vpop.f32.mrb[47].mxu0  ;;  %1576 = vmatpush3.bf16.msra.mxu1 %v1108_v15 }
 0x545   :  { %v1109_v23 = vpack.c.bf16 %v1091_v22, %v1088_v19 }
 0x547   :  { %1577 = vmatprep.subr.bf16.mxu1 %v1109_v23 }
 0x548   :  { %1578 = vmatpush3.bf16.msra.mxu1 %v1109_v23 }
 0x549   :  { %1579 = vmatprep.subr.bf16.mxu1 %v1110_v21 }
 0x54c   :  { %1580 = vmatpush3.bf16.msra.mxu1 %v1110_v21 }
 0x54f   :  { %1582 = vmatmul.mubr.bf16.vlgmr.msra.gmra.mrb[32].mxu1 %v2038_v46 }
 0x550   :  { %1585 = vmatprep.mubr.bf16.mxu1 %v2040_v47 }
 0x557   :  { %1586 = vmatmul.mubr.bf16.gmra.mrb[36].mxu1 %v2044_v48 }
 0x558   :  { %1589 = vmatprep.mubr.bf16.mxu1 %v2046_v49 }
 0x55f   :  { %1590 = vmatmul.mubr.bf16.gmra.mrb[40].mxu1 %v2050_v50 }
 0x560   :  { %1593 = vmatprep.mubr.bf16.mxu1 %v2052_v51 }
 0x567   :  { %1594 = vmatmul.mubr.bf16.gmra.mrb[44].mxu1 %v2056_v52 }
 0x622   :  { %v1583_v25 = vpop.f32.mrb[32].mxu1 }
 0x623   :  { %v1161_v26 = vadd.f32 %v1583_v25, %v1307_v24  ;;  %v1152_v27 = vpop.f32.mrb[33].mxu1 }
 0x624   :  { %v1153_v46 = vadd.f32 %v1307_v24, %v1152_v27  ;;  %v1584_v28 = vpop.f32.mrb[34].mxu1 }
 0x625   :  { %1217 = vst [vmem:[#allocation15 + $0x10] sm:$0xff] %v1161_v26  ;;  %v1164_v47 = vadd.f32 %v1584_v28, %v1307_v24  ;;  %v1155_v48 = vpop.f32.mrb[35].mxu1 }
 0x626   :  { %1215 = vst [vmem:[#allocation15] sm:$0xff] %v1153_v46  ;;  %v1156_v49 = vadd.f32 %v1307_v24, %v1155_v48 }
 0x627   :  { %1218 = vst [vmem:[#allocation15 + $0x18] sm:$0xff] %v1164_v47 }
 0x628   :  { %1216 = vst [vmem:[#allocation15 + $0x8] sm:$0xff] %v1156_v49 }
 0x62a   :  { %v1587_v50 = vpop.f32.mrb[36].mxu1 }
 0x62b   :  { %v1177_v51 = vadd.f32 %v1587_v50, %v1307_v24  ;;  %v1168_v29 = vpop.f32.mrb[37].mxu1 }
 0x62c   :  { %v1169_v52 = vadd.f32 %v1307_v24, %v1168_v29  ;;  %v1588_v30 = vpop.f32.mrb[38].mxu1 }
 0x62d   :  { %1221 = vst [vmem:[#allocation15 + $0x30] sm:$0xff] %v1177_v51  ;;  %v1180_v31 = vadd.f32 %v1588_v30, %v1307_v24  ;;  %v1171_v32 = vpop.f32.mrb[39].mxu1 }
 0x62e   :  { %1219 = vst [vmem:[#allocation15 + $0x20] sm:$0xff] %v1169_v52  ;;  %v1172_v33 = vadd.f32 %v1307_v24, %v1171_v32 }
 0x62f   :  { %1222 = vst [vmem:[#allocation15 + $0x38] sm:$0xff] %v1180_v31 }
 0x630   :  { %1220 = vst [vmem:[#allocation15 + $0x28] sm:$0xff] %v1172_v33 }
 0x632   :  { %v1591_v34 = vpop.f32.mrb[40].mxu1 }
 0x633   :  { %v1193_v35 = vadd.f32 %v1591_v34, %v1307_v24  ;;  %v1184_v36 = vpop.f32.mrb[41].mxu1 }
 0x634   :  { %v1185_v37 = vadd.f32 %v1307_v24, %v1184_v36  ;;  %v1592_v38 = vpop.f32.mrb[42].mxu1 }
 0x635   :  { %1225 = vst [vmem:[#allocation15 + $0x50] sm:$0xff] %v1193_v35  ;;  %v1196_v39 = vadd.f32 %v1592_v38, %v1307_v24  ;;  %v1187_v41 = vpop.f32.mrb[43].mxu1 }
 0x636   :  { %1223 = vst [vmem:[#allocation15 + $0x40] sm:$0xff] %v1185_v37  ;;  %v1188_v43 = vadd.f32 %v1307_v24, %v1187_v41 }
 0x637   :  { %1226 = vst [vmem:[#allocation15 + $0x58] sm:$0xff] %v1196_v39 }
 0x638   :  { %1224 = vst [vmem:[#allocation15 + $0x48] sm:$0xff] %v1188_v43 }
 0x63a   :  { %v1595_v44 = vpop.f32.mrb[44].mxu1 }
 0x63b   :  { %v1209_v45 = vadd.f32 %v1595_v44, %v1307_v24  ;;  %v1200_v40 = vpop.f32.mrb[45].mxu1 }
 0x63c   :  { %v1201_v53 = vadd.f32 %v1307_v24, %v1200_v40  ;;  %v1596_v54 = vpop.f32.mrb[46].mxu1 }
 0x63d   :  { %1229 = vst [vmem:[#allocation15 + $0x70] sm:$0xff] %v1209_v45  ;;  %v1212_v55 = vadd.f32 %v1596_v54, %v1307_v24  ;;  %v1203_v57 = vpop.f32.mrb[47].mxu1 }
 0x63e   :  { %1227 = vst [vmem:[#allocation15 + $0x60] sm:$0xff] %v1201_v53  ;;  %v1204_v58 = vadd.f32 %v1307_v24, %v1203_v57 }
 0x63f   :  { %1230 = vst [vmem:[#allocation15 + $0x78] sm:$0xff] %v1212_v55 }
 0x640   :  { %1228 = vst [vmem:[#allocation15 + $0x68] sm:$0xff] %v1204_v58 }
 0x641   :  { %1822 = shalt.err (!%p1819_p4)
}
 0x642   :  { %s1823_s14 = scalar_lea.hbm %s2142_s10, 2048 }
 0x643   :  { %p1824_p5 = scmp.ne.s32.totalorder %s2142_s10, %s1823_s14  ;;  %p1827_p6 = scmp.lt.u32.totalorder %s1823_s14, %s2142_s10 }
 0x645   :  { %p1829_p7 = pnand %p1827_p6, %p1824_p5 }
 0x647   :  { %1832 = shalt.err (!%p1829_p7)
}
 0x648   :  { %s1855_s8 = smov 128   ;;  %s1856_s23 = smov 8  }
 0x649   :  { %1242 = dma.vmem_to_hbm [thread:$0]  %s1237_s15, 2048, %s2142_s10, [#allocation6], %s1855_s8, %s1855_s8, %s1856_s23  }
 0x64a   :  { %1843 = dma.done.wait [#allocation6], 2048  }
 0x64b   :  { %1844 = vsyncadd [#allocation6], 4294965248 }
 0x64c   :  { %1246 = vsyncpa [#allocation5], 1 }
 0x64d   :  { %1247 = vsyncpa [#allocation8], 1 }
 0x64e   :  { %1248 = vsyncpa [#allocation11], 1 }
 0x64f   :  { %1249 = vsyncpa [#allocation14], 1 }
 0x650   :  { %1250 = vsyncpa [#allocation6], 1 }
 0x651   :  { %1251 = vsyncmov [#allocation3] }
 0x654   :  { %s1252_s26 = vpop.sfrf %1251 }
 0x655   :  { %p1308_p8 = scmp.ne.s32.totalorder %s1252_s26, 0 }
 0x657   :  { %1256 = shalt.err (%p1308_p8)  }

</bundles_post_ra>
